<compile_context>
chip_gen: v6e
topology: v6e:2x2x1
jax: 0.10.0
libtpu: 0.0.40
codegen_flags: <defaults>
</compile_context>

<pallas_src>
import functools

import jax
import jax.numpy as jnp
from jax import lax
from jax.experimental import pallas as pl
from jax.experimental.pallas import tpu as pltpu

EMB = 32            # config.emb_size
NEG_SLOPE = 0.01    # torch.nn.LeakyReLU default negative_slope


def _leaky_relu(v):
    return jnp.where(v > 0, v, NEG_SLOPE * v)


def _round_up(x, m):
    return ((x + m - 1) // m) * m


def global_node_kernel(x_ref, bind_ref, xg_old_ref, wcomb_ref, wt_ref, bpack_ref,
                       out_ref, m_acc, s_acc, xg_acc,
                       *, n_nodes, n_graphs, emb, block_n):
    F = emb
    B = n_graphs
    t = pl.program_id(0)

    @pl.when(t == 0)
    def _init():
        # Finite sentinel (not -inf) so corr = exp(m_old - m_new) never hits inf-inf.
        m_acc[...] = jnp.full_like(m_acc, -1e30)
        s_acc[...] = jnp.zeros_like(s_acc)
        xg_acc[...] = jnp.zeros_like(xg_acc)

    # Row validity for the (possibly ragged) last node tile.  Invalid rows would
    # otherwise read stale VMEM and could poison the matmuls with NaN/Inf.
    row_valid = (t * block_n
                 + lax.broadcasted_iota(jnp.int32, (block_n, 1), 0)) < n_nodes
    x = jnp.where(row_valid, x_ref[...], 0.0)                         # [tN, F]

    # Fused gate+feature matmul: Wcomb = [Wf | Wg], bias row 0 = [bf | bg].
    z = (jnp.dot(x, wcomb_ref[...], preferred_element_type=jnp.float32)
         + bpack_ref[0:1, :])                                         # [tN, F+1]
    feat = _leaky_relu(z[:, :F])                                      # [tN, F]
    gate = z[:, F:F + 1]                                              # [tN, 1]

    # Graph-membership mask built in-kernel from int32 graph ids (computed once,
    # reused by both selects below).
    col = lax.broadcasted_iota(jnp.int32, (block_n, B), 1)
    mbool = (bind_ref[...] == col) & row_valid                        # [tN, B]

    # Online (streaming) softmax over the node axis, one column per graph.
    masked = jnp.where(mbool, gate, jnp.float32(-1e30))               # [tN, B]
    m_new = jnp.maximum(m_acc[...], jnp.max(masked, axis=0, keepdims=True))  # [1, B]
    corr = jnp.exp(m_acc[...] - m_new)                                # [1, B]
    e = jnp.where(mbool, jnp.exp(gate - m_new), 0.0)                  # [tN, B]
    s_acc[...] = corr * s_acc[...] + jnp.sum(e, axis=0, keepdims=True)
    # Weighted segment sum kept in [F, B] layout so `corr` ([1, B]) broadcasts
    # over sublanes with no transpose: xg_acc[f, b] += sum_n feat[n, f] * e[n, b].
    xg_acc[...] = corr * xg_acc[...] + lax.dot_general(
        feat, e, (((0,), (0,)), ((), ())), preferred_element_type=jnp.float32)
    m_acc[...] = m_new

    @pl.when(t == pl.num_programs(0) - 1)
    def _finalize():
        # Clamp guards the (degenerate) empty-graph column: gives 0 instead of NaN.
        inv_s = pl.reciprocal(jnp.maximum(s_acc[...], jnp.float32(1e-30)),
                              approx=True)                            # [1, B]
        xg_fb = xg_acc[...] * inv_s                                   # [F, B] == xg^T
        xg_old = xg_old_ref[...]                                      # [B, F]
        # h = xg @ Wt1 + xg_old @ Wt2 + bt, with xg supplied transposed ([F, B]).
        h = (lax.dot_general(xg_fb, wt_ref[0:F, :], (((0,), (0,)), ((), ())),
                             preferred_element_type=jnp.float32)
             + jnp.dot(xg_old, wt_ref[F:2 * F, :],
                       preferred_element_type=jnp.float32)
             + bpack_ref[1:2, :F])                                    # [B, F]
        out_ref[...] = _leaky_relu(h) + xg_old


def global_node(xg_old, x, batch_ind, params, *, block_n=None):
    """xg_old: [B, F] f32, x: [N, F] f32, batch_ind: [N] int (graph id per node)."""
    N, F = x.shape
    B, _ = xg_old.shape
    wg, bg, wf, bf, wt1, wt2, bt = params

    # --- one-time host-side packing (plain JAX glue) ---
    wcomb = jnp.concatenate([wf, wg], axis=1)                     # [F, F+1]
    wt = jnp.concatenate([wt1, wt2], axis=0)                      # [2F, F]
    bpack = jnp.concatenate(
        [jnp.concatenate([bf, bg], axis=1),                       # row 0: [bf | bg]
         jnp.concatenate([bt, jnp.zeros((1, 1), jnp.float32)], axis=1)],  # row 1: [bt|0]
        axis=0)                                                   # [2, F+1]
    bind = batch_ind.astype(jnp.int32).reshape(N, 1)              # [N, 1]

    if block_n is None:
        block_n = min(512, _round_up(N, 8))
    block_n = _round_up(max(8, min(block_n, _round_up(N, 8))), 8)
    n_tiles = pl.cdiv(N, block_n)

    kernel = functools.partial(global_node_kernel,
                               n_nodes=N, n_graphs=B, emb=F, block_n=block_n)

    grid_spec = pltpu.PrefetchScalarGridSpec(
        num_scalar_prefetch=0,
        grid=(n_tiles,),
        in_specs=[
            pl.BlockSpec((block_n, F), lambda t: (t, 0)),     # x tile
            pl.BlockSpec((block_n, 1), lambda t: (t, 0)),     # batch_ind tile
            pl.BlockSpec((B, F), lambda t: (0, 0)),           # xg_old (resident)
            pl.BlockSpec((F, F + 1), lambda t: (0, 0)),       # Wcomb = [Wf | Wg]
            pl.BlockSpec((2 * F, F), lambda t: (0, 0)),       # Wt = [Wt1 ; Wt2]
            pl.BlockSpec((2, F + 1), lambda t: (0, 0)),       # bias pack
        ],
        out_specs=pl.BlockSpec((B, F), lambda t: (0, 0)),
        scratch_shapes=[
            pltpu.VMEM((1, B), jnp.float32),    # running max  (per graph)
            pltpu.VMEM((1, B), jnp.float32),    # running sum  (per graph)
            pltpu.VMEM((F, B), jnp.float32),    # running weighted feature sum (xg^T)
        ],
    )

    return pl.pallas_call(
        kernel,
        out_shape=jax.ShapeDtypeStruct((B, F), jnp.float32),
        grid_spec=grid_spec,
        compiler_params=pltpu.CompilerParams(
            dimension_semantics=("arbitrary",)),   # reduction axis; no cross-TC split
    )(x, bind, xg_old, wcomb, wt, bpack)


def reference(xg_old, x, batch_ind, params):
    """Pure-JAX reference (mirrors torch_geometric GlobalAttention + transform)."""
    wg, bg, wf, bf, wt1, wt2, bt = params
    B = xg_old.shape[0]
    gate = x @ wg + bg                               # [N, 1]
    feat = _leaky_relu(x @ wf + bf)                  # [N, F]
    mask = batch_ind[:, None] == jnp.arange(B)[None, :]
    masked = jnp.where(mask, gate, -jnp.inf)
    m = jnp.max(masked, axis=0, keepdims=True)
    e = jnp.where(mask, jnp.exp(gate - m), 0.0)
    alpha = e / jnp.sum(e, axis=0, keepdims=True)    # [N, B]
    xg = alpha.T @ feat                              # [B, F]
    cat = jnp.concatenate([xg, xg_old], axis=1)
    h = _leaky_relu(cat @ jnp.concatenate([wt1, wt2], axis=0) + bt)
    return h + xg_old


def init_params(key, F):
    """Deterministic synthetic parameters (PyTorch-Linear-style uniform init)."""
    ks = jax.random.split(key, 7)

    def u(k, shape, fan_in):
        bound = 1.0 / jnp.sqrt(fan_in)
        return jax.random.uniform(k, shape, jnp.float32, -bound, bound)

    wg = u(ks[0], (F, 1), F)          # att_mask: Linear(F, 1)
    bg = u(ks[1], (1, 1), F)
    wf = u(ks[2], (F, F), F)          # att_feat: Linear(F, F)
    bf = u(ks[3], (1, F), F)
    wt1 = u(ks[4], (F, F), 2 * F)     # transform: Linear(2F, F) split row-wise
    wt2 = u(ks[5], (F, F), 2 * F)     #   (wt1 acts on xg, wt2 acts on xg_old)
    bt = u(ks[6], (1, F), 2 * F)
    return (wg, bg, wf, bf, wt1, wt2, bt)


if __name__ == "__main__":
    key = jax.random.PRNGKey(0)
    k_x, k_old, k_p = jax.random.split(key, 3)

    F = EMB       # emb_size = 32
    N = 16        # total nodes across the batch of graphs
    B = 2         # number of graphs

    x = jax.random.normal(k_x, (N, F), jnp.float32)
    xg_old = jax.random.normal(k_old, (B, F), jnp.float32)
    batch_ind = jnp.array([0] * 9 + [1] * 7, dtype=jnp.int32)   # graph id per node
    params = init_params(k_p, F)

    # block_n=8 -> grid=(2,): exercises the online-softmax accumulation path.
    out = global_node(xg_old, x, batch_ind, params, block_n=8)
    out = jax.block_until_ready(out)

    ref = reference(xg_old, x, batch_ind, params)
    assert out.shape == (B, F)
    # Tolerance loosened slightly for the approximate EUP reciprocal in the
    # softmax denominator; real bugs produce O(0.1+) errors and still trip this.
    assert jnp.allclose(out, ref, atol=1e-2, rtol=1e-2), "mismatch vs JAX reference"

    print("KERNEL_OK")
</pallas_src>

<mosaic_0001>
module attributes {stable_mosaic.version = 11 : i64} {
  func.func @global_node_kernel(%arg0: i32, %arg1: memref<8x32xf32, #tpu.memory_space<vmem>>, %arg2: memref<8x1xi32, #tpu.memory_space<vmem>>, %arg3: memref<2x32xf32, #tpu.memory_space<vmem>>, %arg4: memref<32x33xf32, #tpu.memory_space<vmem>>, %arg5: memref<64x32xf32, #tpu.memory_space<vmem>>, %arg6: memref<2x33xf32, #tpu.memory_space<vmem>>, %arg7: memref<2x32xf32, #tpu.memory_space<vmem>>, %arg8: memref<1x2xf32, #tpu.memory_space<vmem>>, %arg9: memref<1x2xf32, #tpu.memory_space<vmem>>, %arg10: memref<32x2xf32, #tpu.memory_space<vmem>>) attributes {dimension_semantics = [#tpu.dimension_semantics<arbitrary>], iteration_bounds = array<i64: 2>, scalar_prefetch = 0 : i64, scratch_operands = 3 : i64, tpu.core_type = #tpu.core_type<tc>, window_params = [{transform_indices = @transform_0, window_bounds = array<i64: 8, 32>}, {transform_indices = @transform_1, window_bounds = array<i64: 8, 1>}, {pipeline_mode = #tpu.pipeline_mode<synchronous>, transform_indices = @transform_2, window_bounds = array<i64: 2, 32>}, {pipeline_mode = #tpu.pipeline_mode<synchronous>, transform_indices = @transform_3, window_bounds = array<i64: 32, 33>}, {pipeline_mode = #tpu.pipeline_mode<synchronous>, transform_indices = @transform_4, window_bounds = array<i64: 64, 32>}, {pipeline_mode = #tpu.pipeline_mode<synchronous>, transform_indices = @transform_5, window_bounds = array<i64: 2, 33>}, {pipeline_mode = #tpu.pipeline_mode<synchronous>, transform_indices = @transform_6, window_bounds = array<i64: 2, 32>}]} {
    %c0_i32 = arith.constant 0 : i32
    %0 = arith.cmpi eq, %arg0, %c0_i32 : i32
    %1 = arith.extui %0 : i1 to i32
    %c0_i32_0 = arith.constant 0 : i32
    %2 = arith.cmpi ne, %1, %c0_i32_0 : i32
    scf.if %2 {
      %cst_31 = arith.constant -1.000000e+30 : f32
      %65 = vector.broadcast %cst_31 : f32 to vector<1x2xf32>
      %c0_32 = arith.constant 0 : index
      %c0_33 = arith.constant 0 : index
      %66 = vector.load %arg8[%c0_32, %c0_33] : memref<1x2xf32, #tpu.memory_space<vmem>>, vector<1x2xf32>
      tpu.vector_store %arg8[%c0_32, %c0_33], %65 {strides = array<i32>} : memref<1x2xf32, #tpu.memory_space<vmem>>, vector<1x2xf32>,
      %cst_34 = arith.constant 0.000000e+00 : f32
      %67 = vector.broadcast %cst_34 : f32 to vector<1x2xf32>
      %c0_35 = arith.constant 0 : index
      %c0_36 = arith.constant 0 : index
      %68 = vector.load %arg9[%c0_35, %c0_36] : memref<1x2xf32, #tpu.memory_space<vmem>>, vector<1x2xf32>
      tpu.vector_store %arg9[%c0_35, %c0_36], %67 {strides = array<i32>} : memref<1x2xf32, #tpu.memory_space<vmem>>, vector<1x2xf32>,
      %cst_37 = arith.constant 0.000000e+00 : f32
      %69 = vector.broadcast %cst_37 : f32 to vector<32x2xf32>
      %c0_38 = arith.constant 0 : index
      %c0_39 = arith.constant 0 : index
      %70 = vector.load %arg10[%c0_38, %c0_39] : memref<32x2xf32, #tpu.memory_space<vmem>>, vector<32x2xf32>
      tpu.vector_store %arg10[%c0_38, %c0_39], %69 {strides = array<i32>} : memref<32x2xf32, #tpu.memory_space<vmem>>, vector<32x2xf32>,
    } else {
    }
    %c8_i32 = arith.constant 8 : i32
    %3 = arith.muli %arg0, %c8_i32 : i32
    %4 = tpu.iota {dimensions = array<i32: 0>} : vector<8x1xi32>
    %5 = vector.broadcast %3 : i32 to vector<8x1xi32>
    %6 = arith.addi %5, %4 : vector<8x1xi32>
    %c16_i32 = arith.constant 16 : i32
    %7 = vector.broadcast %c16_i32 : i32 to vector<8x1xi32>
    %8 = arith.cmpi slt, %6, %7 : vector<8x1xi32>
    %c0 = arith.constant 0 : index
    %c0_1 = arith.constant 0 : index
    %9 = vector.load %arg1[%c0, %c0_1] : memref<8x32xf32, #tpu.memory_space<vmem>>, vector<8x32xf32>
    %cst = arith.constant 0.000000e+00 : f32
    %10 = vector.shape_cast %8 : vector<8x1xi1> to vector<8x1xi1>
    %11 = vector.broadcast %10 : vector<8x1xi1> to vector<8x32xi1>
    %12 = vector.broadcast %cst : f32 to vector<8x32xf32>
    %13 = arith.select %11, %9, %12 : vector<8x32xi1>, vector<8x32xf32>
    %c0_2 = arith.constant 0 : index
    %c0_3 = arith.constant 0 : index
    %14 = vector.load %arg4[%c0_2, %c0_3] : memref<32x33xf32, #tpu.memory_space<vmem>>, vector<32x33xf32>
    %cst_4 = arith.constant dense<0.000000e+00> : vector<8x33xf32>
    %15 = tpu.matmul %13, %14, %cst_4 {dimension_numbers = #tpu.dot_dimension_numbers<[1], [0], [0], [1], [0, 0, 1, 1], [], []>} : vector<8x32xf32>, vector<32x33xf32>, vector<8x33xf32> -> vector<8x33xf32>
    %c0_5 = arith.constant 0 : index
    %c0_6 = arith.constant 0 : index
    %16 = vector.load %arg6[%c0_5, %c0_6] : memref<2x33xf32, #tpu.memory_space<vmem>>, vector<1x33xf32>
    %17 = vector.broadcast %16 : vector<1x33xf32> to vector<8x33xf32>
    %18 = arith.addf %15, %17 : vector<8x33xf32>
    %19 = vector.extract_strided_slice %18 {offsets = [0, 0], sizes = [8, 32], strides = [1, 1]} : vector<8x33xf32> to vector<8x32xf32>
    %cst_7 = arith.constant 0.000000e+00 : f32
    %20 = vector.broadcast %cst_7 : f32 to vector<8x32xf32>
    %21 = arith.cmpf ogt, %19, %20 : vector<8x32xf32>
    %cst_8 = arith.constant 0.00999999977 : f32
    %22 = vector.broadcast %cst_8 : f32 to vector<8x32xf32>
    %23 = arith.mulf %22, %19 : vector<8x32xf32>
    %24 = arith.select %21, %19, %23 : vector<8x32xi1>, vector<8x32xf32>
    %25 = vector.extract_strided_slice %18 {offsets = [0, 32], sizes = [8, 1], strides = [1, 1]} : vector<8x33xf32> to vector<8x1xf32>
    %26 = tpu.iota {dimensions = array<i32: 1>} : vector<8x2xi32>
    %c0_9 = arith.constant 0 : index
    %c0_10 = arith.constant 0 : index
    %27 = vector.load %arg2[%c0_9, %c0_10] : memref<8x1xi32, #tpu.memory_space<vmem>>, vector<8x1xi32>
    %28 = vector.broadcast %27 : vector<8x1xi32> to vector<8x2xi32>
    %29 = arith.cmpi eq, %28, %26 : vector<8x2xi32>
    %30 = vector.broadcast %8 : vector<8x1xi1> to vector<8x2xi1>
    %31 = arith.andi %29, %30 : vector<8x2xi1>
    %cst_11 = arith.constant -1.000000e+30 : f32
    %32 = vector.shape_cast %25 : vector<8x1xf32> to vector<8x1xf32>
    %33 = vector.broadcast %32 : vector<8x1xf32> to vector<8x2xf32>
    %34 = vector.broadcast %cst_11 : f32 to vector<8x2xf32>
    %35 = arith.select %31, %33, %34 : vector<8x2xi1>, vector<8x2xf32>
    %c0_12 = arith.constant 0 : index
    %c0_13 = arith.constant 0 : index
    %36 = vector.load %arg8[%c0_12, %c0_13] : memref<1x2xf32, #tpu.memory_space<vmem>>, vector<1x2xf32>
    %cst_14 = arith.constant dense<0xFF800000> : vector<2xf32>
    %37 = vector.multi_reduction <maximumf>, %35, %cst_14 [0] : vector<8x2xf32> to vector<2xf32>
    %38 = vector.shape_cast %37 : vector<2xf32> to vector<1x2xf32>
    %39 = arith.maximumf %36, %38 : vector<1x2xf32>
    %c0_15 = arith.constant 0 : index
    %c0_16 = arith.constant 0 : index
    %40 = vector.load %arg8[%c0_15, %c0_16] : memref<1x2xf32, #tpu.memory_space<vmem>>, vector<1x2xf32>
    %41 = arith.subf %40, %39 : vector<1x2xf32>
    %42 = math.exp %41 : vector<1x2xf32>
    %43 = vector.broadcast %25 : vector<8x1xf32> to vector<8x2xf32>
    %44 = vector.broadcast %39 : vector<1x2xf32> to vector<8x2xf32>
    %45 = arith.subf %43, %44 : vector<8x2xf32>
    %46 = math.exp %45 : vector<8x2xf32>
    %cst_17 = arith.constant 0.000000e+00 : f32
    %47 = vector.broadcast %cst_17 : f32 to vector<8x2xf32>
    %48 = arith.select %31, %46, %47 : vector<8x2xi1>, vector<8x2xf32>
    %c0_18 = arith.constant 0 : index
    %c0_19 = arith.constant 0 : index
    %49 = vector.load %arg9[%c0_18, %c0_19] : memref<1x2xf32, #tpu.memory_space<vmem>>, vector<1x2xf32>
    %50 = arith.mulf %42, %49 : vector<1x2xf32>
    %cst_20 = arith.constant dense<0.000000e+00> : vector<2xf32>
    %51 = vector.multi_reduction <add>, %48, %cst_20 [0] : vector<8x2xf32> to vector<2xf32>
    %52 = vector.shape_cast %51 : vector<2xf32> to vector<1x2xf32>
    %53 = arith.addf %50, %52 : vector<1x2xf32>
    %c0_21 = arith.constant 0 : index
    %c0_22 = arith.constant 0 : index
    %54 = vector.load %arg9[%c0_21, %c0_22] : memref<1x2xf32, #tpu.memory_space<vmem>>, vector<1x2xf32>
    tpu.vector_store %arg9[%c0_21, %c0_22], %53 {strides = array<i32>} : memref<1x2xf32, #tpu.memory_space<vmem>>, vector<1x2xf32>,
    %c0_23 = arith.constant 0 : index
    %c0_24 = arith.constant 0 : index
    %55 = vector.load %arg10[%c0_23, %c0_24] : memref<32x2xf32, #tpu.memory_space<vmem>>, vector<32x2xf32>
    %56 = vector.broadcast %42 : vector<1x2xf32> to vector<32x2xf32>
    %57 = arith.mulf %56, %55 : vector<32x2xf32>
    %cst_25 = arith.constant dense<0.000000e+00> : vector<32x2xf32>
    %58 = tpu.matmul %24, %48, %cst_25 {dimension_numbers = #tpu.dot_dimension_numbers<[0], [0], [1], [1], [0, 1, 1, 1], [], []>} : vector<8x32xf32>, vector<8x2xf32>, vector<32x2xf32> -> vector<32x2xf32>
    %59 = arith.addf %57, %58 : vector<32x2xf32>
    %c0_26 = arith.constant 0 : index
    %c0_27 = arith.constant 0 : index
    %60 = vector.load %arg10[%c0_26, %c0_27] : memref<32x2xf32, #tpu.memory_space<vmem>>, vector<32x2xf32>
    tpu.vector_store %arg10[%c0_26, %c0_27], %59 {strides = array<i32>} : memref<32x2xf32, #tpu.memory_space<vmem>>, vector<32x2xf32>,
    %c0_28 = arith.constant 0 : index
    %c0_29 = arith.constant 0 : index
    %61 = vector.load %arg8[%c0_28, %c0_29] : memref<1x2xf32, #tpu.memory_space<vmem>>, vector<1x2xf32>
    tpu.vector_store %arg8[%c0_28, %c0_29], %39 {strides = array<i32>} : memref<1x2xf32, #tpu.memory_space<vmem>>, vector<1x2xf32>,
    %c1_i32 = arith.constant 1 : i32
    %62 = arith.cmpi eq, %arg0, %c1_i32 : i32
    %63 = arith.extui %62 : i1 to i32
    %c0_i32_30 = arith.constant 0 : i32
    %64 = arith.cmpi ne, %63, %c0_i32_30 : i32
    scf.if %64 {
      %c0_31 = arith.constant 0 : index
      %c0_32 = arith.constant 0 : index
      %65 = vector.load %arg9[%c0_31, %c0_32] : memref<1x2xf32, #tpu.memory_space<vmem>>, vector<1x2xf32>
      %cst_33 = arith.constant 1.000000e-30 : f32
      %66 = vector.broadcast %cst_33 : f32 to vector<1x2xf32>
      %67 = arith.maximumf %65, %66 : vector<1x2xf32>
      %68 = tpu.reciprocal %67 {approx = true} : vector<1x2xf32> -> vector<1x2xf32>
      %c0_34 = arith.constant 0 : index
      %c0_35 = arith.constant 0 : index
      %69 = vector.load %arg10[%c0_34, %c0_35] : memref<32x2xf32, #tpu.memory_space<vmem>>, vector<32x2xf32>
      %70 = vector.broadcast %68 : vector<1x2xf32> to vector<32x2xf32>
      %71 = arith.mulf %69, %70 : vector<32x2xf32>
      %c0_36 = arith.constant 0 : index
      %c0_37 = arith.constant 0 : index
      %72 = vector.load %arg3[%c0_36, %c0_37] : memref<2x32xf32, #tpu.memory_space<vmem>>, vector<2x32xf32>
      %c0_38 = arith.constant 0 : index
      %c0_39 = arith.constant 0 : index
      %73 = vector.load %arg5[%c0_38, %c0_39] : memref<64x32xf32, #tpu.memory_space<vmem>>, vector<32x32xf32>
      %cst_40 = arith.constant dense<0.000000e+00> : vector<2x32xf32>
      %74 = tpu.matmul %71, %73, %cst_40 {dimension_numbers = #tpu.dot_dimension_numbers<[0], [0], [1], [1], [0, 1, 1, 1], [], []>} : vector<32x2xf32>, vector<32x32xf32>, vector<2x32xf32> -> vector<2x32xf32>
      %c32 = arith.constant 32 : index
      %c0_41 = arith.constant 0 : index
      %75 = vector.load %arg5[%c32, %c0_41] : memref<64x32xf32, #tpu.memory_space<vmem>>, vector<32x32xf32>
      %cst_42 = arith.constant dense<0.000000e+00> : vector<2x32xf32>
      %76 = tpu.matmul %72, %75, %cst_42 {dimension_numbers = #tpu.dot_dimension_numbers<[1], [0], [0], [1], [0, 0, 1, 1], [], []>} : vector<2x32xf32>, vector<32x32xf32>, vector<2x32xf32> -> vector<2x32xf32>
      %77 = arith.addf %74, %76 : vector<2x32xf32>
      %c1 = arith.constant 1 : index
      %c0_43 = arith.constant 0 : index
      %78 = vector.load %arg6[%c1, %c0_43] : memref<2x33xf32, #tpu.memory_space<vmem>>, vector<1x32xf32>
      %79 = vector.broadcast %78 : vector<1x32xf32> to vector<2x32xf32>
      %80 = arith.addf %77, %79 : vector<2x32xf32>
      %cst_44 = arith.constant 0.000000e+00 : f32
      %81 = vector.broadcast %cst_44 : f32 to vector<2x32xf32>
      %82 = arith.cmpf ogt, %80, %81 : vector<2x32xf32>
      %cst_45 = arith.constant 0.00999999977 : f32
      %83 = vector.broadcast %cst_45 : f32 to vector<2x32xf32>
      %84 = arith.mulf %83, %80 : vector<2x32xf32>
      %85 = arith.select %82, %80, %84 : vector<2x32xi1>, vector<2x32xf32>
      %86 = arith.addf %85, %72 : vector<2x32xf32>
      %c0_46 = arith.constant 0 : index
      %c0_47 = arith.constant 0 : index
      %87 = vector.load %arg7[%c0_46, %c0_47] : memref<2x32xf32, #tpu.memory_space<vmem>>, vector<2x32xf32>
      tpu.vector_store %arg7[%c0_46, %c0_47], %86 {strides = array<i32>} : memref<2x32xf32, #tpu.memory_space<vmem>>, vector<2x32xf32>,
    } else {
    }
    return
  }
  func.func @transform_0(%arg0: i32) -> (i32, i32) {
    %c0_i32 = arith.constant 0 : i32
    %c0_i32_0 = arith.constant 0 : i32
    return %arg0, %c0_i32 : i32, i32
  }
  func.func @transform_1(%arg0: i32) -> (i32, i32) {
    %c0_i32 = arith.constant 0 : i32
    %c0_i32_0 = arith.constant 0 : i32
    return %arg0, %c0_i32 : i32, i32
  }
  func.func @transform_2(%arg0: i32) -> (i32, i32) {
    %c0_i32 = arith.constant 0 : i32
    %c0_i32_0 = arith.constant 0 : i32
    %c0_i32_1 = arith.constant 0 : i32
    return %c0_i32, %c0_i32_0 : i32, i32
  }
  func.func @transform_3(%arg0: i32) -> (i32, i32) {
    %c0_i32 = arith.constant 0 : i32
    %c0_i32_0 = arith.constant 0 : i32
    %c0_i32_1 = arith.constant 0 : i32
    return %c0_i32, %c0_i32_0 : i32, i32
  }
  func.func @transform_4(%arg0: i32) -> (i32, i32) {
    %c0_i32 = arith.constant 0 : i32
    %c0_i32_0 = arith.constant 0 : i32
    %c0_i32_1 = arith.constant 0 : i32
    return %c0_i32, %c0_i32_0 : i32, i32
  }
  func.func @transform_5(%arg0: i32) -> (i32, i32) {
    %c0_i32 = arith.constant 0 : i32
    %c0_i32_0 = arith.constant 0 : i32
    %c0_i32_1 = arith.constant 0 : i32
    return %c0_i32, %c0_i32_0 : i32, i32
  }
  func.func @transform_6(%arg0: i32) -> (i32, i32) {
    %c0_i32 = arith.constant 0 : i32
    %c0_i32_0 = arith.constant 0 : i32
    %c0_i32_1 = arith.constant 0 : i32
    return %c0_i32, %c0_i32_0 : i32, i32
  }
}

</mosaic_0001>

<bundles_post_ra>
// kernel: tpu_custom_call.1
= control target key start
LH: loop header
LB: loop body
LE: loop exit
PB: predicated region body
PF: predicated region fallthrough
CT: control target
= control target key end

     0   :  { %11 = vsyncpa [#allocation6], 0  ;;  %s1035_s21 = smov 0   ;;  %s1155_s0 = inlined_call_operand.vmem [shape: f32[16,32], index: 0, kind: input, shape index: {}]   ;;  %s1156_s1 = inlined_call_operand.vmem [shape: s32[16,1], index: 1, kind: input, shape index: {}]   ;;  %s1157_s2 = inlined_call_operand.vmem [shape: f32[2,32], index: 2, kind: input, shape index: {}]   ;;  %s1158_s3 = inlined_call_operand.vmem [shape: f32[32,33], index: 3, kind: input, shape index: {}]   ;;  %s1159_s4 = inlined_call_operand.vmem [shape: f32[64,32], index: 4, kind: input, shape index: {}]   ;;  %s1160_s5 = inlined_call_operand.vmem [shape: f32[2,33], index: 5, kind: input, shape index: {}]   ;;  %s1161_s6 = inlined_call_operand.hbm [shape: f32[2,32], index: 6, kind: output, shape index: {}]  }
   0x1 LB: > { %s1041_s22 = sadd.s32 4294967295, %s989_s21   ;;  %p843_p0 = scmp.ge.s32.totalorder %s989_s21, 1  ;;  %s989_s21 = sphi %s1035_s21, %s17_s21  }
   0x2   : > { %p216_p1 = scmp.lt.s32.totalorder %s989_s21, 3 }
   0x4   : > { %p217_p2 = pnand %p843_p0, %p216_p1 }
   0x5   : > { %p244_p3 = scmp.lt.s32.totalorder (!%p217_p2), %s1041_s22, 1  ;;  %p846_p4 = scmp.ne.s32.totalorder (!%p217_p2), %s1041_s22, 0 }
   0x6   : > { %220 = sbr.rel (%p217_p2) target bundleno = 953 (0x3b9), region = 44 }
   0xb   : > { %s245_s23 = scalar_select %p244_p3, %s1041_s22, 1 }
   0xc   : > { %255 = sbr.rel (%p846_p4) target bundleno = 21 (0x15), region = 48 }
   0xd   : > { %s844_s24 = sshll.u32 %s245_s23, 3 }
   0xe   : > { %s1050_s27 = scalar_lea.vmem %s1155_s0, %s844_s24  ;;  %s251_s30 = scalar_lea.vmem %s1156_s1, %s844_s24 }
  0x11   : > { %vm256_vm0 = vcmask 8192   ;;  %vm259_vm1 = vcmask 15360   ;;  %v991_v0 = vmov -1e+30   ;;  %v992_v1 = vmov 0.0  }
  0x12   : > { %257 = vst.msk [vmem:[#allocation2] sm:$0x1] %vm256_vm0, %v991_v0  ;;  %258 = vst.msk [vmem:[#allocation3] sm:$0x1] %vm256_vm0, %v992_v1 }
  0x13   : > { %260 = vst.msk [vmem:[#allocation4] sm:$0xff] %vm259_vm1, %v992_v1  ;;  %261 = vst.msk [vmem:[#allocation4 + $0x8] sm:$0xff] %vm259_vm1, %v992_v1 }
  0x14   : > { %262 = vst.msk [vmem:[#allocation4 + $0x10] sm:$0xff] %vm259_vm1, %v992_v1  ;;  %263 = vst.msk [vmem:[#allocation4 + $0x18] sm:$0xff] %vm259_vm1, %v992_v1 }
  0x15 PF: > { %v277_v2 = vld [vmem:[%s1158_s3 + $0x18] sm:$0xff]  ;;  %s847_s9 = sshll.u32 %s1041_s22, 3  ;;  %v265_v3 = vlaneseq  ;;  %v993_v4 = vmov 0.0   ;;  %v276_v5 = vld [vmem:[%s1158_s3 + $0x10] sm:$0xff]  ;;  %vm994_vm2 = vmmov 0   ;;  %v362_v7 = vld [vmem:[%s251_s30] sm:$0xff] }
  0x16   : > { %883 = vmatprep.subr.mxu0 %v993_v4  ;;  %891 = vmatprep.mubr.msk.f32.mxu0 %vm994_vm2, %v993_v4  ;;  %v267_v6 = vstv %s847_s9  ;;  %v995_v9 = vmov 0   ;;  %v275_v10 = vld [vmem:[%s1158_s3 + $0x8] sm:$0xff]  ;;  %v270_v12 = vld [vmem:[%s1050_s27] sm:$0xff]  ;;  %vm283_vm4 = vcmask 261120   ;;  %v996_v15 = vmov 32   ;;  %p855_p5 = scmp.ne.s32.totalorder %s1041_s22, 1 }
  0x17   : > { %884 = vmatpush3.msra.mxu0 %v277_v2  ;;  %v266_v8 = vshrl.u32 %v265_v3, 7  ;;  %947 = vset.pattern.permute.xlu0 %v995_v9  ;;  %v274_v13 = vld [vmem:[%s1158_s3] sm:$0xff]  ;;  %v361_v22 = vand.u32 127, %v265_v3  ;;  %vm375_vm7 = vcmask 15360   ;;  %vm455_vm9 = vcmask 64512  }
  0x18   : > { %885 = vmatprep.subr.mxu0 %v993_v4  ;;  %364 = vperm.xlu0 %947, %v362_v7   ;;  %v848_v16 = vld [vmem:[%s1160_s5] ss:$0 sm:$0xff]  ;;  %vm407_vm10 = vcmask 8192  }
  0x19   : > { %886 = vmatpush3.msra.mxu0 %v276_v5  ;;  %v268_v11 = vadd.s32 %v267_v6, %v266_v8  ;;  %v374_v34 = vld [vmem:[#allocation2] sm:$0x1]  ;;  %v1084_v35 = vsub.s32 0, %v266_v8  ;;  %v397_v55 = vld [vmem:[#allocation3] sm:$0x1] }
  0x1a   : > { %887 = vmatprep.subr.mxu0 %v993_v4  ;;  %v410_v60 = vld [vmem:[#allocation4 + $0x8] sm:$0xff]  ;;  %v409_v61 = vld [vmem:[#allocation4] sm:$0xff] }
  0x1b   : > { %888 = vmatpush3.msra.mxu0 %v275_v10  ;;  %vm269_vm3 = vcmp.lt.s32.totalorder %v268_v11, 16  ;;  %v412_v0 = vld [vmem:[#allocation4 + $0x18] sm:$0xff] }
  0x1c   : > { %889 = vmatprep.subr.mxu0 %v993_v4  ;;  %v273_v14 = vsel %vm269_vm3, %v270_v12, 0.0  ;;  %948 = vset.pattern.permute.xlu0 %v996_v15  ;;  %v411_v4 = vld [vmem:[#allocation4 + $0x10] sm:$0xff] }
  0x1d   : > { %890 = vmatpush3.msra.mxu0 %v274_v13 }
  0x1e   : > { %892 = vmatmul.mubr.msk.f32.vlgmr.msra.gmra.mxu0 %vm283_vm4, %v273_v14 }
  0x93   : > { %v365_v23 = vpop.permute.xlu0 %364 }
  0x94   : > { %vm366_vm6 = vcmp.eq.s32.totalorder %v365_v23, %v361_v22 }
  0x95   : > { %vm1076_vm8 = vmand %vm366_vm6, %vm269_vm3 }
  0xde   : > { %v353_v17 = vpop.f32.mrf.mxu0 }
  0xdf   : > { %v354_v18 = vadd.f32 %v848_v16, %v353_v17 }
  0xe0   : > { %v893_v19 = vpop.f32.mrf.mxu0 }
  0xe1   : > { %370 = vperm.xlu0 %948, %v354_v18   ;;  %vm357_vm5 = vcmp.gt.f32.partialorder %v354_v18, 0.0  ;;  %v358_v20 = vmul.f32 0.01, %v354_v18 }
  0xe3   : > { %v359_v21 = vsel %vm357_vm5, %v354_v18, %v358_v20 }
  0xe4   : > { %423 = vxpose.xlu1.b32.start.end [1/1] (short) (narrow) %v359_v21, 32 }
 0x15c   : > { %v371_v25 = vpop.permute.xlu0 %370 }
 0x15d   : > { %v373_v26 = vsel %vm1076_vm8, %v371_v25, -1e+30 }
 0x15e   : > { %v376_v27 = vsel %vm375_vm7, %v373_v26, -inf }
 0x15f   : > { %v377_v28 = vrot.slane %v376_v27, 4 }
 0x160   : > { %v439_v29 = vpop.trf.xlu1 }
 0x161   : > { %v378_v30 = vmax.f32 %v376_v27, %v377_v28  ;;  %896 = vmatprep.mubr.msk.f32.mxu1 %vm455_vm9, %v439_v29 }
 0x163   : > { %v379_v31 = vrot.slane %v378_v30, 2 }
 0x164   : > { %v440_v43 = vpop.trf.xlu1 }
 0x165   : > { %v380_v32 = vmax.f32 %v378_v30, %v379_v31 }
 0x167   : > { %v381_v33 = vrot.slane %v380_v32, 1 }
 0x168   : > { %v441_v45 = vpop.trf.xlu1 }
 0x169   : > { %v382_v36 = vmax.f32 %v380_v32, %v381_v33 }
 0x16b   : > { %v383_v37 = vmax.f32 %v374_v34, %v382_v36 }
 0x16c   : > { %v442_v51 = vpop.trf.xlu1 }
 0x16d   : > { %v384_v38 = vsub.f32 %v374_v34, %v383_v37  ;;  %v391_v39 = vrot.slane %v383_v37, %v1084_v35  ;;  %561 = vst.msk [vmem:[#allocation2] sm:$0x1] %vm407_vm10, %v383_v37 }
 0x16f   : > { %v385_v40 = vmul.f32 1.442695, %v384_v38  ;;  %v393_v41 = vsub.f32 %v371_v25, %v391_v39 }
 0x171   : > { %949 = vpow2.f32 %v385_v40  ;;  %v394_v42 = vmul.f32 1.442695, %v393_v41 }
 0x173   : > { %951 = vpow2.f32 %v394_v42 }
 0x17e   : > { %v950_v44 = vpop.eup %949 }
 0x17f   : > { %v417_v46 = vrot.slane %v950_v44, %v1084_v35  ;;  %v398_v57 = vmul.f32 %v950_v44, %v397_v55 }
 0x180   : > { %v952_v47 = vpop.eup %951 }
 0x181   : > { %v396_v48 = vsel %vm1076_vm8, %v952_v47, 0.0  ;;  %894 = vmatprep.subr.msk.mxu1 %vm1076_vm8, %v952_v47  ;;  %v420_v62 = vmul.f32 %v417_v46, %v410_v60  ;;  %v419_v2 = vmul.f32 %v417_v46, %v409_v61  ;;  %v422_v6 = vmul.f32 %v417_v46, %v412_v0 }
 0x182   : > { %v399_v49 = vsel %vm375_vm7, %v396_v48, 0.0  ;;  %895 = vmatpush3.msk.msra.mxu1 %vm1076_vm8, %v952_v47  ;;  %v421_v9 = vmul.f32 %v417_v46, %v411_v4 }
 0x183   : > { %v400_v50 = vrot.slane %v399_v49, 4  ;;  %897 = vmatmul.mubr.msk.f32.vlgmr.msra.gmra.mxu1 %vm455_vm9, %v440_v43 }
 0x184   : > { %899 = vmatprep.mubr.msk.f32.mxu1 %vm455_vm9, %v441_v45 }
 0x185   : > { %v401_v52 = vadd.f32 %v400_v50, %v399_v49 }
 0x187   : > { %v402_v53 = vrot.slane %v401_v52, 2  ;;  %900 = vmatmul.mubr.msk.f32.gmra.mxu1 %vm455_vm9, %v442_v51 }
 0x189   : > { %v403_v54 = vadd.f32 %v402_v53, %v401_v52 }
 0x18b   : > { %v404_v56 = vrot.slane %v403_v54, 1 }
 0x18d   : > { %v405_v58 = vadd.f32 %v404_v56, %v403_v54 }
 0x18f   : > { %v406_v59 = vadd.f32 %v405_v58, %v398_v57 }
 0x191   : > { %408 = vst.msk [vmem:[#allocation3] sm:$0x1] %vm407_vm10, %v406_v59 }
 0x243   : > { %v898_v63 = vpop.f32.mrf.mxu1 }
 0x244   : > { %v554_v1 = vadd.f32 %v898_v63, %v420_v62 }
 0x245   : > { %v534_v3 = vpop.f32.mrf.mxu1 }
 0x246   : > { %558 = vst.msk [vmem:[#allocation4 + $0x8] sm:$0xff] %vm375_vm7, %v554_v1  ;;  %v553_v5 = vadd.f32 %v534_v3, %v419_v2 }
 0x247   : > { %v901_v7 = vpop.f32.mrf.mxu1 }
 0x248   : > { %557 = vst.msk [vmem:[#allocation4] sm:$0xff] %vm375_vm7, %v553_v5  ;;  %v556_v8 = vadd.f32 %v901_v7, %v422_v6  ;;  %565 = sbr.rel (%p855_p5) target bundleno = 938 (0x3aa), region = 52 }
 0x249   : > { %v544_v10 = vpop.f32.mrf.mxu1 }
 0x24a   : > { %560 = vst.msk [vmem:[#allocation4 + $0x18] sm:$0xff] %vm375_vm7, %v556_v8  ;;  %v555_v11 = vadd.f32 %v544_v10, %v421_v9 }
 0x24c   : > { %559 = vst.msk [vmem:[#allocation4 + $0x10] sm:$0xff] %vm375_vm7, %v555_v11 }
 0x24d   : > { %v566_v12 = vld [vmem:[#allocation3] sm:$0x1]  ;;  %v997_v14 = vmov 0.0   ;;  %v591_v15 = vld [vmem:[%s1159_s4 + $0x38] sm:$0xff]  ;;  %v590_v16 = vld [vmem:[%s1159_s4 + $0x30] sm:$0xff]  ;;  %vm998_vm11 = vmmov 0  }
 0x24e   : > { %v567_v13 = vmax.f32 %v566_v12, 1e-30  ;;  %902 = vmatprep.subr.mxu0 %v997_v14  ;;  %913 = vmatprep.subr.mxu1 %v997_v14  ;;  %v587_v17 = vld [vmem:[%s1159_s4 + $0x18] sm:$0xff]  ;;  %v589_v18 = vld [vmem:[%s1159_s4 + $0x28] sm:$0xff]  ;;  %v586_v19 = vld [vmem:[%s1159_s4 + $0x10] sm:$0xff]  ;;  %vm780_vm13 = vcmask 254976  }
 0x24f   : > { %903 = vmatpush3.msra.mxu0 %v591_v15  ;;  %910 = vmatprep.mubr.msk.f32.mxu0 %vm998_vm11, %v997_v14  ;;  %v585_v20 = vld [vmem:[%s1159_s4 + $0x8] sm:$0xff]  ;;  %v588_v21 = vld [vmem:[%s1159_s4 + $0x20] sm:$0xff] }
 0x250   : > { %953 = vrcp.f32 %v567_v13  ;;  %904 = vmatprep.subr.mxu0 %v997_v14  ;;  %914 = vmatpush3.msra.mxu1 %v587_v17  ;;  %v583_v22 = vld [vmem:[%s1157_s2] sm:$0x3]  ;;  %v569_v25 = vld [vmem:[#allocation4] sm:$0xff]  ;;  %v570_v27 = vld [vmem:[#allocation4 + $0x8] sm:$0xff] }
 0x251   : > { %905 = vmatpush3.msra.mxu0 %v590_v16  ;;  %915 = vmatprep.subr.mxu1 %v997_v14  ;;  %v584_v23 = vld [vmem:[%s1159_s4] sm:$0xff] }
 0x252   : > { %906 = vmatprep.subr.mxu0 %v997_v14  ;;  %916 = vmatpush3.msra.mxu1 %v586_v19  ;;  %v572_v32 = vld [vmem:[#allocation4 + $0x18] sm:$0xff] }
 0x253   : > { %907 = vmatpush3.msra.mxu0 %v589_v18  ;;  %917 = vmatprep.subr.mxu1 %v997_v14  ;;  %v571_v30 = vld [vmem:[#allocation4 + $0x10] sm:$0xff] }
 0x254   : > { %908 = vmatprep.subr.mxu0 %v997_v14  ;;  %918 = vmatpush3.msra.mxu1 %v585_v20 }
 0x255   : > { %909 = vmatpush3.msra.mxu0 %v588_v21  ;;  %919 = vmatprep.subr.mxu1 %v997_v14 }
 0x256   : > { %911 = vmatmul.mubr.msk.f32.vlgmr.msra.gmra.mxu0 %vm283_vm4, %v583_v22  ;;  %920 = vmatpush3.msra.mxu1 %v584_v23 }
 0x257   : > { %921 = vmatprep.mubr.msk.f32.mxu1 %vm998_vm11, %v997_v14 }
 0x25d   : > { %v954_v24 = vpop.eup %953 }
 0x25e   : > { %v577_v26 = vrot.slane %v954_v24, %v1084_v35  ;;  %v858_v35 = vld [vmem:[%s1160_s5 + $0x1] ss:$0 sm:$0xff] }
 0x260   : > { %v579_v28 = vmul.f32 %v577_v26, %v569_v25  ;;  %v580_v29 = vmul.f32 %v577_v26, %v570_v27  ;;  %v581_v31 = vmul.f32 %v577_v26, %v571_v30  ;;  %v582_v33 = vmul.f32 %v577_v26, %v572_v32 }
 0x262   : > { %665 = vxpose.xlu0.b32.start [1/4] (short) (narrow) %v579_v28, 8 }
 0x266   : > { %666 = vxpose.xlu0.b32.cont [2/4] (short) (narrow) %v580_v29, 8 }
 0x26a   : > { %667 = vxpose.xlu0.b32.cont [3/4] (short) (narrow) %v581_v31, 8 }
 0x26e   : > { %668 = vxpose.xlu0.b32.end [4/4] (short) (narrow) %v582_v33, 8 }
 0x2de   : > { %v681_v34 = vpop.trf.xlu0 }
 0x2df   : > { %922 = vmatmul.mubr.msk.f32.vlgmr.msra.gmra.mxu1 %vm283_vm4, %v681_v34 }
 0x316   : > { %v661_v36 = vpop.f32.mrf.mxu0 }
 0x318   : > { %v912_v37 = vpop.f32.mrf.mxu0 }
 0x39f   : > { %v766_v38 = vpop.f32.mrf.mxu1 }
 0x3a0   : > { %v767_v39 = vadd.f32 %v766_v38, %v661_v36 }
 0x3a1   : > { %v923_v40 = vpop.f32.mrf.mxu1 }
 0x3a2   : > { %v775_v41 = vadd.f32 %v858_v35, %v767_v39 }
 0x3a4   : > { %vm776_vm12 = vcmp.gt.f32.partialorder %v775_v41, 0.0  ;;  %v777_v42 = vmul.f32 0.01, %v775_v41 }
 0x3a6   : > { %v778_v43 = vsel %vm776_vm12, %v775_v41, %v777_v42 }
 0x3a7   : > { %v779_v44 = vadd.f32 %v778_v43, %v583_v22 }
 0x3a9   : > { %781 = vst.msk [vmem:[#allocation5] sm:$0x3] %vm780_vm13, %v779_v44 }
 0x3aa PF: > { %p928_p6 = scmp.eq.s32.totalorder %s1041_s22, 1  ;;  %s999_s16 = smov [#allocation5]  }
 0x3ab   : > { %s789_s17 = sshll.u32 %s999_s16, 4  ;;  %s790_s17 = int_to_ptr.vmem [resolvable:$true] %s789_s17 }
 0x3ac   : > { %s955_s18 = scalar_lea.vmem %s790_s17, 32  ;;  %p962_p10 = scmp.lt.s32.totalorder %s790_s17, %s790_s17 }
 0x3ad   : > { %p956_p7 = scmp.ne.s32.totalorder %s790_s17, %s955_s18  ;;  %p963_p11 = scmp.lt.s32.totalorder %s955_s18, %s955_s18 }
 0x3af   : > { %p957_p8 = pnand %p956_p7, %p928_p6  ;;  %p964_p12 = por %p963_p11, %p962_p10 }
 0x3b1   : > { %p958_p9 = pneg %p957_p8 }
 0x3b3   : > { %p965_p13 = pnand %p964_p12, %p958_p9 }
 0x3b5   : > { %968 = shalt.err (!%p965_p13)
}
 0x3b6   : > { %925 = dma.vmem_to_hbm [thread:$0]  (%p928_p6), %s790_s17, 32, %s1161_s6, [#allocation6]  }
 0x3b7   : > { %984 = dma.done.wait (%p928_p6), [#allocation6], 32  }
 0x3b8   : > { %986 = vsyncadd (%p928_p6), [#allocation6], 4294967264 }
 0x3b9 PF: > { %s17_s21 = sadd.s32 1, %s989_s21  }
 0x3ba   : > { %p14_p0 = scmp.ge.s32.totalorder %s17_s21, 4  }
 0x3bc   :  { %16 = sbr.rel (!%p14_p0) target bundleno = 1 (0x1), region = 82 }
 0x3c1   :  { %802 = vsyncpa [#allocation6], 1 }
 0x3c2   :  { %804 = vsyncpa [#allocation6 + $0x1], 1 }

</bundles_post_ra>
